<compile_context>
chip_gen: v5e
topology: v5e:2x2
jax: 0.10.0
libtpu: 0.0.40
codegen_flags: <defaults>
</compile_context>

<pallas_src>
import jax
import jax.numpy as jnp
from jax.experimental import pallas as pl
from jax.experimental.pallas import tpu as pltpu


TARGET_BLOCK_BYTES = 4 << 20                      # ~4 MiB per array per block
LANE_CANDIDATES = (1024, 512, 384, 256, 128)      # multiples of 128, largest first
FALLBACK_LANE = 512                               # used only on the rare padded path
MAX_VMEM_LIMIT = 64 << 20                         # v7x physical VMEM per TC


def ytmt_kernel(l_ref, r_ref, ol_ref, or_ref):
    l = l_ref[...]
    r = r_ref[...]
    zero = jnp.zeros((), l.dtype)
    l_pos = jnp.maximum(l, zero)          # relu(input_l)
    r_pos = jnp.maximum(r, zero)          # relu(input_r)
    l_neg = jnp.minimum(l, zero)          # input_l - relu(input_l)
    r_neg = jnp.minimum(r, zero)          # input_r - relu(input_r)
    ol_ref[...] = l_pos + r_neg
    or_ref[...] = r_pos + l_neg


def additive_ytmt_head(input_l, input_r):
    """input_l, input_r: same shape / dtype (e.g. NCHW feature maps)."""
    assert input_l.shape == input_r.shape, "inputs must have the same shape"
    assert input_l.dtype == input_r.dtype, "inputs must have the same dtype"

    orig_shape = input_l.shape
    dtype = input_l.dtype
    itemsize = jnp.dtype(dtype).itemsize
    total = 1
    for d in orig_shape:
        total *= int(d)
    assert total > 0, "empty input"

    # dtype-aware sublane tile: 8 for 4-byte, 16 for 2-byte, 32 for 1-byte dtypes.
    packing = max(1, 4 // itemsize)
    sublane = 8 * packing

    # Lane width: largest multiple of 128 dividing the flattened size -> zero-copy path.
    lane = None
    for cand in LANE_CANDIDATES:
        if total % cand == 0:
            lane = cand
            break

    needs_pad = lane is None
    if needs_pad:
        # Rare fallback for non-128-aligned sizes: pad the flattened inputs only
        # up to a lane multiple (no block-multiple padding) and slice outputs.
        # TODO(synk): a body+tail split would avoid even this copy.
        lane = FALLBACK_LANE
        rows = pl.cdiv(total, lane)
        total_pad = rows * lane
    else:
        rows = total // lane
        total_pad = total

    # Row tile: as large as fits the target block size, multiple of the packed
    # sublane tile; a small tensor becomes one full-extent block (always legal).
    target_rows = max(sublane, (TARGET_BLOCK_BYTES // (lane * itemsize)) // sublane * sublane)
    block_rows = rows if rows <= target_rows else target_rows
    num_blocks = pl.cdiv(rows, block_rows)

    # v7x megacore: give the "parallel" axis >= 2 steps when the tensor allows it,
    # so both TensorCores get work instead of one sitting idle.
    if num_blocks == 1 and rows >= 2 * sublane:
        block_rows = pl.cdiv(pl.cdiv(rows, 2), sublane) * sublane
        num_blocks = pl.cdiv(rows, block_rows)

    # VMEM: 2 inputs + 2 outputs, each double-buffered by the BlockSpec pipeline.
    block_bytes = block_rows * lane * itemsize
    vmem_limit = max(16 << 20, min(MAX_VMEM_LIMIT, 8 * block_bytes + (8 << 20)))
    assert 8 * block_bytes <= MAX_VMEM_LIMIT, "block too large for VMEM budget"

    def prep(x):
        x = x.reshape(-1)
        if needs_pad:
            x = jnp.pad(x, (0, total_pad - total))   # zeros are fixed points of the op
        return x.reshape(rows, lane)

    l2 = prep(input_l)
    r2 = prep(input_r)

    spec = pl.BlockSpec((block_rows, lane), lambda i: (i, 0))

    cost = pl.CostEstimate(
        flops=6 * total,                       # 2 max + 2 min + 2 add per element
        transcendentals=0,
        bytes_accessed=4 * total * itemsize,   # 2 reads + 2 writes
    )

    out_l2, out_r2 = pl.pallas_call(
        ytmt_kernel,
        out_shape=(
            jax.ShapeDtypeStruct((rows, lane), dtype),
            jax.ShapeDtypeStruct((rows, lane), dtype),
        ),
        grid_spec=pltpu.PrefetchScalarGridSpec(
            num_scalar_prefetch=0,
            grid=(num_blocks,),
            in_specs=[spec, spec],
            out_specs=(spec, spec),
        ),
        compiler_params=pltpu.CompilerParams(
            dimension_semantics=("parallel",),   # sharded across v7x's 2 TCs; loop on 1-TC chips
            vmem_limit_bytes=vmem_limit,
        ),
        cost_estimate=cost,
    )(l2, r2)

    if needs_pad:
        out_l = out_l2.reshape(-1)[:total].reshape(orig_shape)
        out_r = out_r2.reshape(-1)[:total].reshape(orig_shape)
    else:
        out_l = out_l2.reshape(orig_shape)       # pure reshape, no copy
        out_r = out_r2.reshape(orig_shape)
    return out_l, out_r


def additive_ytmt_head_ref(input_l, input_r):
    """Pure-JAX reference matching the PyTorch forward."""
    out_lp = jnp.maximum(input_l, 0.0)
    out_ln = input_l - out_lp
    out_rp = jnp.maximum(input_r, 0.0)
    out_rn = input_r - out_rp
    return out_lp + out_rn, out_rp + out_ln


if __name__ == "__main__":
    N, C, H, W = 2, 4, 16, 16
    key = jax.random.PRNGKey(0)
    kl, kr = jax.random.split(key)
    input_l = jax.random.normal(kl, (N, C, H, W), dtype=jnp.float32)
    input_r = jax.random.normal(kr, (N, C, H, W), dtype=jnp.float32)

    out_l, out_r = additive_ytmt_head(input_l, input_r)
    out_l = jax.block_until_ready(out_l)
    out_r = jax.block_until_ready(out_r)

    ref_l, ref_r = additive_ytmt_head_ref(input_l, input_r)
    assert out_l.shape == (N, C, H, W) and out_r.shape == (N, C, H, W)
    assert jnp.allclose(out_l, ref_l, atol=1e-6, rtol=1e-6), "out_l mismatch vs reference"
    assert jnp.allclose(out_r, ref_r, atol=1e-6, rtol=1e-6), "out_r mismatch vs reference"

    print("KERNEL_OK")
</pallas_src>

<mosaic_0001>
module attributes {stable_mosaic.version = 11 : i64} {
  func.func @ytmt_kernel(%arg0: i32, %arg1: memref<2x1024xf32, #tpu.memory_space<vmem>>, %arg2: memref<2x1024xf32, #tpu.memory_space<vmem>>, %arg3: memref<2x1024xf32, #tpu.memory_space<vmem>>, %arg4: memref<2x1024xf32, #tpu.memory_space<vmem>>) attributes {dimension_semantics = [#tpu.dimension_semantics<parallel>], iteration_bounds = array<i64: 1>, scalar_prefetch = 0 : i64, scratch_operands = 0 : i64, tpu.core_type = #tpu.core_type<tc>, window_params = [{transform_indices = @transform_0, window_bounds = array<i64: 2, 1024>}, {transform_indices = @transform_1, window_bounds = array<i64: 2, 1024>}, {transform_indices = @transform_2, window_bounds = array<i64: 2, 1024>}, {transform_indices = @transform_3, window_bounds = array<i64: 2, 1024>}]} {
    %c0 = arith.constant 0 : index
    %c0_0 = arith.constant 0 : index
    %0 = vector.load %arg1[%c0, %c0_0] : memref<2x1024xf32, #tpu.memory_space<vmem>>, vector<2x1024xf32>
    %c0_1 = arith.constant 0 : index
    %c0_2 = arith.constant 0 : index
    %1 = vector.load %arg2[%c0_1, %c0_2] : memref<2x1024xf32, #tpu.memory_space<vmem>>, vector<2x1024xf32>
    %cst = arith.constant 0.000000e+00 : f32
    %2 = vector.broadcast %cst : f32 to vector<2x1024xf32>
    %3 = arith.maximumf %0, %2 : vector<2x1024xf32>
    %cst_3 = arith.constant 0.000000e+00 : f32
    %4 = vector.broadcast %cst_3 : f32 to vector<2x1024xf32>
    %5 = arith.maximumf %1, %4 : vector<2x1024xf32>
    %cst_4 = arith.constant 0.000000e+00 : f32
    %6 = vector.broadcast %cst_4 : f32 to vector<2x1024xf32>
    %7 = arith.minimumf %0, %6 : vector<2x1024xf32>
    %cst_5 = arith.constant 0.000000e+00 : f32
    %8 = vector.broadcast %cst_5 : f32 to vector<2x1024xf32>
    %9 = arith.minimumf %1, %8 : vector<2x1024xf32>
    %10 = arith.addf %3, %9 : vector<2x1024xf32>
    %c0_6 = arith.constant 0 : index
    %c0_7 = arith.constant 0 : index
    %11 = vector.load %arg3[%c0_6, %c0_7] : memref<2x1024xf32, #tpu.memory_space<vmem>>, vector<2x1024xf32>
    tpu.vector_store %arg3[%c0_6, %c0_7], %10 {strides = array<i32>} : memref<2x1024xf32, #tpu.memory_space<vmem>>, vector<2x1024xf32>,
    %12 = arith.addf %5, %7 : vector<2x1024xf32>
    %c0_8 = arith.constant 0 : index
    %c0_9 = arith.constant 0 : index
    %13 = vector.load %arg4[%c0_8, %c0_9] : memref<2x1024xf32, #tpu.memory_space<vmem>>, vector<2x1024xf32>
    tpu.vector_store %arg4[%c0_8, %c0_9], %12 {strides = array<i32>} : memref<2x1024xf32, #tpu.memory_space<vmem>>, vector<2x1024xf32>,
    return
  }
  func.func @transform_0(%arg0: i32) -> (i32, i32) {
    %c0_i32 = arith.constant 0 : i32
    %c0_i32_0 = arith.constant 0 : i32
    return %arg0, %c0_i32 : i32, i32
  }
  func.func @transform_1(%arg0: i32) -> (i32, i32) {
    %c0_i32 = arith.constant 0 : i32
    %c0_i32_0 = arith.constant 0 : i32
    return %arg0, %c0_i32 : i32, i32
  }
  func.func @transform_2(%arg0: i32) -> (i32, i32) {
    %c0_i32 = arith.constant 0 : i32
    %c0_i32_0 = arith.constant 0 : i32
    return %arg0, %c0_i32 : i32, i32
  }
  func.func @transform_3(%arg0: i32) -> (i32, i32) {
    %c0_i32 = arith.constant 0 : i32
    %c0_i32_0 = arith.constant 0 : i32
    return %arg0, %c0_i32 : i32, i32
  }
}

</mosaic_0001>

<bundles_post_ra>
// kernel: tpu_custom_call.1
= control target key start
LH: loop header
LB: loop body
LE: loop exit
PB: predicated region body
PF: predicated region fallthrough
CT: control target
= control target key end

     0   :  { %9 = vsyncpa [#allocation3], 0  ;;  %s241_s0 = inlined_call_operand.hbm [shape: f32[2,1024], index: 0, kind: input, shape index: {}]   ;;  %s242_s1 = inlined_call_operand.hbm [shape: f32[2,1024], index: 1, kind: input, shape index: {}]   ;;  %s243_s2 = inlined_call_operand.hbm [shape: f32[2,1024], index: 2, kind: output, shape index: {0}]   ;;  %s244_s3 = inlined_call_operand.hbm [shape: f32[2,1024], index: 3, kind: output, shape index: {1}]  }
   0x1   :  { %10 = vsyncpa [#allocation6], 0 }
   0x2   :  { %11 = vsyncpa [#allocation4], 0 }
   0x3   :  { %12 = vsyncpa [#allocation9], 0  ;;  %s18_s14 = sshll.u32 %s241_s0, 4  ;;  %s205_s15 = smov [#allocation2]   ;;  %s19_s14 = int_to_ptr.hbm [resolvable:$true] %s18_s14 }
   0x4   :  { %s20_s16 = sshll.u32 %s205_s15, 4  ;;  %s29_s19 = sshll.u32 %s242_s1, 4  ;;  %s21_s16 = int_to_ptr.vmem [resolvable:$true] %s20_s16  ;;  %s30_s19 = int_to_ptr.hbm [resolvable:$true] %s29_s19 }
   0x5   :  { %23 = dma.hbm_to_vmem [thread:$0]  %s19_s14, 256, %s21_s16, [#allocation3]  }
   0x6   :  { %s206_s20 = smov [#allocation5]  }
   0x7   :  { %s31_s21 = sshll.u32 %s206_s20, 4  ;;  %s32_s21 = int_to_ptr.vmem [resolvable:$true] %s31_s21 }
   0x8   :  { %34 = dma.hbm_to_vmem [thread:$0]  %s30_s19, 256, %s32_s21, [#allocation6]  }
   0x9   :  { %197 = dma.done.wait [#allocation3], 256  }
   0xa   :  { %198 = vsyncadd [#allocation3], 4294967040 }
   0xb   :  { %199 = dma.done.wait [#allocation6], 256  }
   0xc   :  { %200 = vsyncadd [#allocation6], 4294967040  ;;  %v43_v0 = vld [vmem:[#allocation2] sm:$0xff]  ;;  %v45_v1 = vld [vmem:[#allocation5] sm:$0xff]  ;;  %s70_s23 = sshll.u32 %s243_s2, 4  ;;  %s207_s1 = smov [#allocation7]   ;;  %s71_s23 = int_to_ptr.hbm [resolvable:$true] %s70_s23 }
   0xd   :  { %v44_v2 = vld [vmem:[#allocation2 + $0x8] sm:$0xff]  ;;  %v47_v3 = vmax.f32 %v43_v0, 0.0  ;;  %v53_v4 = vmin.f32 %v45_v1, 0.0  ;;  %v46_v5 = vld [vmem:[#allocation5 + $0x8] sm:$0xff]  ;;  %v49_v7 = vmax.f32 %v45_v1, 0.0  ;;  %s68_s24 = sshll.u32 %s207_s1, 4  ;;  %s69_s24 = int_to_ptr.vmem [resolvable:$true] %s68_s24 }
   0xe   :  { %v48_v6 = vmax.f32 %v44_v2, 0.0  ;;  %v54_v8 = vmin.f32 %v46_v5, 0.0  ;;  %v51_v9 = vmin.f32 %v43_v0, 0.0  ;;  %v50_v10 = vmax.f32 %v46_v5, 0.0  ;;  %s208_s25 = smov [#allocation8]   ;;  %s81_s29 = sshll.u32 %s244_s3, 4  ;;  %s82_s29 = int_to_ptr.hbm [resolvable:$true] %s81_s29 }
   0xf   :  { %v52_v11 = vmin.f32 %v44_v2, 0.0  ;;  %v55_v12 = vadd.f32 %v53_v4, %v47_v3  ;;  %s79_s26 = sshll.u32 %s208_s25, 4  ;;  %s80_s26 = int_to_ptr.vmem [resolvable:$true] %s79_s26 }
  0x10   :  { %v56_v13 = vadd.f32 %v54_v8, %v48_v6  ;;  %v59_v14 = vadd.f32 %v51_v9, %v49_v7 }
  0x11   :  { %v60_v15 = vadd.f32 %v52_v11, %v50_v10  ;;  %57 = vst [vmem:[#allocation7] sm:$0xff] %v55_v12 }
  0x12   :  { %58 = vst [vmem:[#allocation7 + $0x8] sm:$0xff] %v56_v13 }
  0x13   :  { %61 = vst [vmem:[#allocation8] sm:$0xff] %v59_v14  ;;  %73 = dma.vmem_to_hbm [thread:$0]  %s69_s24, 256, %s71_s23, [#allocation4]  }
  0x14   :  { %62 = vst [vmem:[#allocation8 + $0x8] sm:$0xff] %v60_v15 }
  0x15   :  { %84 = dma.vmem_to_hbm [thread:$0]  %s80_s26, 256, %s82_s29, [#allocation9]  }
  0x16   :  { %201 = dma.done.wait [#allocation4], 256  }
  0x17   :  { %202 = vsyncadd [#allocation4], 4294967040 }
  0x18   :  { %203 = dma.done.wait [#allocation9], 256  }
  0x19   :  { %204 = vsyncadd [#allocation9], 4294967040 }
  0x1a   :  { %93 = vsyncpa [#allocation3], 1 }
  0x1b   :  { %94 = vsyncpa [#allocation6], 1 }
  0x1c   :  { %95 = vsyncpa [#allocation4], 1 }
  0x1d   :  { %96 = vsyncpa [#allocation9], 1 }

</bundles_post_ra>
